<compile_context>
chip_gen: v7x
topology: tpu7x:2x2x1
jax: 0.10.0
libtpu: 0.0.40
codegen_flags: <defaults>
</compile_context>

<pallas_src>
import functools
import numpy as np
import jax
import jax.numpy as jnp
from jax import lax
from jax.experimental import pallas as pl
from jax.experimental.pallas import tpu as pltpu

F32 = jnp.float32
NEG = -1e9
VMEM_LIMIT = 48 * 1024 * 1024


def _vmem():
    return pl.BlockSpec(memory_space=pltpu.MemorySpace.VMEM)


# Tile candidates. N/K favor 256 (v6e/v7x MXU native width), fall back to 128, else full dim.
_M_TILES = (512, 256, 128, 64, 32, 16, 8)
_N_TILES = (256, 128)
_K_TILES = (512, 256, 128)


def _pick_tile(dim, candidates):
    for c in candidates:
        if dim >= c and dim % c == 0:
            return c
    return dim  # full dim (always legal: block equals the array extent)


# ----------------------------- tiled dense: y = x @ W + b (+ optional act) -----------------------------
def _dense_kernel(x_ref, w_ref, b_ref, o_ref, acc_ref, *, act):
    @pl.when(pl.program_id(2) == 0)
    def _():
        acc_ref[...] = jnp.zeros_like(acc_ref)

    acc_ref[...] += jnp.dot(x_ref[...], w_ref[...], preferred_element_type=jnp.float32)

    @pl.when(pl.program_id(2) == pl.num_programs(2) - 1)
    def _():
        y = acc_ref[...] + b_ref[...]
        if act == "gelu":
            # TODO(synk): HF BERT default is exact erf-GELU; tanh approximation used (EUP-friendly).
            y = 0.5 * y * (1.0 + jnp.tanh(0.7978845608028654 * (y + 0.044715 * y * y * y)))
        elif act == "tanh":
            y = jnp.tanh(y)
        o_ref[...] = y.astype(o_ref.dtype)


def dense(x, w_kn, b_1n, act=None):
    # x: (M, K); w_kn: (K, N) (pre-transposed torch weight); b_1n: (1, N)
    M, K = x.shape
    N = w_kn.shape[1]
    tm = _pick_tile(M, _M_TILES)
    tn = _pick_tile(N, _N_TILES)
    tk = _pick_tile(K, _K_TILES)
    grid = (M // tm, N // tn, K // tk)
    return pl.pallas_call(
        functools.partial(_dense_kernel, act=act),
        out_shape=jax.ShapeDtypeStruct((M, N), F32),
        grid=grid,
        in_specs=[
            pl.BlockSpec((tm, tk), lambda i, j, k: (i, k)),
            pl.BlockSpec((tk, tn), lambda i, j, k: (k, j)),
            pl.BlockSpec((1, tn), lambda i, j, k: (0, j)),
        ],
        out_specs=pl.BlockSpec((tm, tn), lambda i, j, k: (i, j)),
        scratch_shapes=[pltpu.VMEM((tm, tn), jnp.float32)],
        compiler_params=pltpu.CompilerParams(
            dimension_semantics=("parallel", "parallel", "arbitrary"),
            vmem_limit_bytes=VMEM_LIMIT),
    )(x, w_kn, b_1n)


# ----------------------------- dense + residual add + LayerNorm (fused epilogue) -----------------------------
def _dense_ln_kernel(x_ref, w_ref, b_ref, r_ref, g_ref, bt_ref, o_ref, acc_ref, *, eps):
    @pl.when(pl.program_id(1) == 0)
    def _():
        acc_ref[...] = jnp.zeros_like(acc_ref)

    acc_ref[...] += jnp.dot(x_ref[...], w_ref[...], preferred_element_type=jnp.float32)

    @pl.when(pl.program_id(1) == pl.num_programs(1) - 1)
    def _():
        y = acc_ref[...] + b_ref[...] + r_ref[...]
        mu = jnp.mean(y, axis=-1, keepdims=True)
        yc = y - mu
        var = jnp.mean(yc * yc, axis=-1, keepdims=True)
        o_ref[...] = (yc * lax.rsqrt(var + eps) * g_ref[...] + bt_ref[...]).astype(o_ref.dtype)


def dense_add_layernorm(x, w_kn, b_1n, res, gamma_1n, beta_1n, eps=1e-12):
    # LayerNorm needs the full feature dim per row, so N is kept un-tiled (N = hidden size).
    M, K = x.shape
    N = w_kn.shape[1]
    tm = _pick_tile(M, _M_TILES)
    tk = _pick_tile(K, _K_TILES)
    grid = (M // tm, K // tk)
    return pl.pallas_call(
        functools.partial(_dense_ln_kernel, eps=eps),
        out_shape=jax.ShapeDtypeStruct((M, N), F32),
        grid=grid,
        in_specs=[
            pl.BlockSpec((tm, tk), lambda i, k: (i, k)),
            pl.BlockSpec((tk, N), lambda i, k: (k, 0)),
            pl.BlockSpec((1, N), lambda i, k: (0, 0)),
            pl.BlockSpec((tm, N), lambda i, k: (i, 0)),
            pl.BlockSpec((1, N), lambda i, k: (0, 0)),
            pl.BlockSpec((1, N), lambda i, k: (0, 0)),
        ],
        out_specs=pl.BlockSpec((tm, N), lambda i, k: (i, 0)),
        scratch_shapes=[pltpu.VMEM((tm, N), jnp.float32)],
        compiler_params=pltpu.CompilerParams(
            dimension_semantics=("parallel", "arbitrary"),
            vmem_limit_bytes=VMEM_LIMIT),
    )(x, w_kn, b_1n, res, gamma_1n, beta_1n)


# ----------------------------- plain LayerNorm (embeddings, no dummy residual) -----------------------------
def _ln_kernel(x_ref, g_ref, b_ref, o_ref, *, eps):
    x = x_ref[...]
    mu = jnp.mean(x, axis=-1, keepdims=True)
    xc = x - mu
    var = jnp.mean(xc * xc, axis=-1, keepdims=True)
    o_ref[...] = (xc * lax.rsqrt(var + eps) * g_ref[...] + b_ref[...]).astype(o_ref.dtype)


def layernorm(x, gamma_1n, beta_1n, eps=1e-12):
    M, H = x.shape
    tm = _pick_tile(M, _M_TILES)
    return pl.pallas_call(
        functools.partial(_ln_kernel, eps=eps),
        out_shape=jax.ShapeDtypeStruct((M, H), F32),
        grid=(M // tm,),
        in_specs=[pl.BlockSpec((tm, H), lambda i: (i, 0)),
                  pl.BlockSpec((1, H), lambda i: (0, 0)),
                  pl.BlockSpec((1, H), lambda i: (0, 0))],
        out_specs=pl.BlockSpec((tm, H), lambda i: (i, 0)),
        compiler_params=pltpu.CompilerParams(dimension_semantics=("parallel",)),
    )(x, gamma_1n, beta_1n)


# ----------------------------- attention (per batch element; heads split in-kernel) -----------------------------
def _attn_kernel(qkv_ref, m_ref, o_ref, *, nh, dh, hidden, scale):
    m = m_ref[0]                                           # (1, S) additive key mask
    outs = []
    for h in range(nh):                                    # static lane slices per head
        q = qkv_ref[0, :, h * dh:(h + 1) * dh] * scale     # scale folded into Q (O(S*dh))
        k = qkv_ref[0, :, hidden + h * dh:hidden + (h + 1) * dh]
        v = qkv_ref[0, :, 2 * hidden + h * dh:2 * hidden + (h + 1) * dh]
        s = lax.dot_general(q, k, (((1,), (1,)), ((), ())),
                            preferred_element_type=jnp.float32)        # (S, S)
        s = s + m
        s = s - jnp.max(s, axis=-1, keepdims=True)
        p = jnp.exp(s)
        p = p * pl.reciprocal(jnp.sum(p, axis=-1, keepdims=True), approx=True)
        outs.append(jnp.dot(p, v, preferred_element_type=jnp.float32))
    o_ref[0] = jnp.concatenate(outs, axis=-1)              # single lane-dense store


def attention(qkv, mask_add, hidden, nh):
    # qkv: (B, S, 3H) from the fused QKV projection; mask_add: (B, 1, S)
    B, S, H3 = qkv.shape
    dh = hidden // nh
    scale = 1.0 / float(np.sqrt(dh))
    return pl.pallas_call(
        functools.partial(_attn_kernel, nh=nh, dh=dh, hidden=hidden, scale=scale),
        out_shape=jax.ShapeDtypeStruct((B, S, hidden), F32),
        grid=(B,),
        in_specs=[pl.BlockSpec((1, S, H3), lambda b: (b, 0, 0)),
                  pl.BlockSpec((1, 1, S), lambda b: (b, 0, 0))],
        out_specs=pl.BlockSpec((1, S, hidden), lambda b: (b, 0, 0)),
        compiler_params=pltpu.CompilerParams(dimension_semantics=("parallel",)),
    )(qkv, mask_add)


# ----------------------------- fused bidirectional LSTM recurrence (time-major) -----------------------------
def _bilstm_kernel(gxf_ref, gxr_ref, whf_ref, whr_ref, o_ref, *, hidden):
    S, TB, _ = gxf_ref.shape
    H = hidden

    def cell(gates, c):
        i = jax.nn.sigmoid(gates[:, 0:H])
        f = jax.nn.sigmoid(gates[:, H:2 * H])
        g = jnp.tanh(gates[:, 2 * H:3 * H])
        o = jax.nn.sigmoid(gates[:, 3 * H:4 * H])
        c = f * c + i * g
        return o * jnp.tanh(c), c

    def step(t, carry):
        hf, cf, hr, cr = carry
        tr = S - 1 - t
        gf = gxf_ref[t] + jnp.dot(hf, whf_ref[...], preferred_element_type=jnp.float32)
        gr = gxr_ref[tr] + jnp.dot(hr, whr_ref[...], preferred_element_type=jnp.float32)
        hf, cf = cell(gf, cf)
        hr, cr = cell(gr, cr)
        o_ref[pl.ds(t, 1), :, 0:H] = hf[None]
        o_ref[pl.ds(tr, 1), :, H:2 * H] = hr[None]
        return hf, cf, hr, cr

    z = jnp.zeros((TB, H), jnp.float32)
    lax.fori_loop(0, S, step, (z, z, z, z))


def bilstm(gx_f, gx_r, whh_f, whh_r, hidden):
    # gx_*: (S, B, 4H) time-major precomputed input projections; whh_*: (H, 4H)
    S, B, G = gx_f.shape
    tb = B if (B < 8 or B % 8 != 0) else 8      # batch tile: full B, or a multiple of 8
    gx_spec = pl.BlockSpec((S, tb, G), lambda i: (0, i, 0))
    w_spec = pl.BlockSpec((hidden, G), lambda i: (0, 0))
    return pl.pallas_call(
        functools.partial(_bilstm_kernel, hidden=hidden),
        out_shape=jax.ShapeDtypeStruct((S, B, 2 * hidden), F32),
        grid=(B // tb,),
        in_specs=[gx_spec, gx_spec, w_spec, w_spec],
        out_specs=pl.BlockSpec((S, tb, 2 * hidden), lambda i: (0, i, 0)),
        compiler_params=pltpu.CompilerParams(dimension_semantics=("parallel",)),
    )(gx_f, gx_r, whh_f, whh_r)


# ----------------------------- CRF Viterbi decode (fori_loop + VMEM backpointer scratch) -----------------------------
def _viterbi_kernel(em_ref, transT_ref, start_ref, end_ref, o_ref, hist_ref):
    S, B, T = em_ref.shape
    transT = transT_ref[...]                               # transT[cur, prev] = trans[prev, cur]

    def fwd(t, score):
        cand = score[:, None, :] + transT[None, :, :]      # (B, cur, prev)
        hist_ref[t] = jnp.argmax(cand, axis=-1).astype(jnp.int32)
        return jnp.max(cand, axis=-1) + em_ref[t]

    score = lax.fori_loop(1, S, fwd, em_ref[0] + start_ref[...])
    score = score + end_ref[...]
    cur = jnp.argmax(score, axis=-1).astype(jnp.int32)     # (B,)
    o_ref[pl.ds(S - 1, 1), :] = cur[None, :]

    iota = lax.broadcasted_iota(jnp.int32, (B, T), 1)      # hoisted out of the loop

    def bwd(j, cur):
        t = S - 1 - j
        onehot = (iota == cur[:, None]).astype(jnp.int32)
        cur = jnp.sum(hist_ref[t] * onehot, axis=-1)       # gather backpointer via one-hot
        o_ref[pl.ds(t - 1, 1), :] = cur[None, :]
        return cur

    lax.fori_loop(0, S - 1, bwd, cur)


def crf_viterbi_decode(emissions_tm, transT, start_1t, end_1t):
    # emissions_tm: (S, B, Tpad) time-major, already lane-dense padded
    S, B, T = emissions_tm.shape
    tags = pl.pallas_call(
        _viterbi_kernel,
        out_shape=jax.ShapeDtypeStruct((S, B), jnp.int32),
        in_specs=[_vmem(), _vmem(), _vmem(), _vmem()],
        out_specs=_vmem(),
        scratch_shapes=[pltpu.VMEM((S, B, T), jnp.int32)],
    )(emissions_tm, transT, start_1t, end_1t)
    return tags.T                                          # (B, S)


# ----------------------------- parameter init (deterministic, synthetic) -----------------------------
def init_params(key, cfg):
    H, I, T, Tpad = cfg["hidden"], cfg["inter"], cfg["num_tags"], cfg["tag_pad"]
    ks = iter(jax.random.split(key, 96))

    def nrm(shape, s=0.02):
        return jax.random.normal(next(ks), shape, F32) * s

    def uni(shape, a):
        return jax.random.uniform(next(ks), shape, F32, -a, a)

    # All dense weights are stored pre-transposed as (in_features, out_features) = torch W^T,
    # so no per-forward weight transposes are needed.
    p = dict(
        word_emb=nrm((cfg["vocab"], H)),
        pos_emb=nrm((cfg["max_pos"], H)),
        type_emb=nrm((2, H)),
        emb_ln_g=jnp.ones((1, H), F32), emb_ln_b=jnp.zeros((1, H), F32),
        layers=[],
    )
    for _ in range(cfg["layers"]):
        p["layers"].append(dict(
            wqkv=nrm((H, 3 * H)), bqkv=jnp.zeros((1, 3 * H), F32),   # fused Q/K/V projection
            wo=nrm((H, H)), bo=jnp.zeros((1, H), F32),
            attn_ln_g=jnp.ones((1, H), F32), attn_ln_b=jnp.zeros((1, H), F32),
            w1=nrm((H, I)), b1=jnp.zeros((1, I), F32),
            w2=nrm((I, H)), b2=jnp.zeros((1, H), F32),
            ffn_ln_g=jnp.ones((1, H), F32), ffn_ln_b=jnp.zeros((1, H), F32),
        ))
    a = 1.0 / float(np.sqrt(H))
    p["lstm"] = dict(
        w_ih_f=uni((H, 4 * H), a), w_hh_f=uni((H, 4 * H), a),
        b_f=(uni((4 * H,), a) + uni((4 * H,), a)).reshape(1, 4 * H),   # b_ih + b_hh
        w_ih_r=uni((H, 4 * H), a), w_hh_r=uni((H, 4 * H), a),
        b_r=(uni((4 * H,), a) + uni((4 * H,), a)).reshape(1, 4 * H),
    )
    # Classifier with CRF tag padding folded in: pad columns have zero weight and -1e9 bias,
    # so emissions are lane-dense (Tpad) and pad tags never win decode.
    p["clf_w"] = jnp.zeros((2 * H, Tpad), F32).at[:, :T].set(nrm((2 * H, T)))
    p["clf_b"] = jnp.full((1, Tpad), NEG, F32).at[:, :T].set(0.0)
    trans = uni((T, T), 0.1)
    trans_p = jnp.full((Tpad, Tpad), NEG, F32).at[:T, :T].set(trans)
    p["crf_transT"] = trans_p.T                                        # [cur, prev], pre-transposed
    p["crf_start"] = jnp.full((1, Tpad), NEG, F32).at[0, :T].set(uni((T,), 0.1))
    p["crf_end"] = jnp.full((1, Tpad), NEG, F32).at[0, :T].set(uni((T,), 0.1))
    return p


# ----------------------------- full forward (NER path) -----------------------------
def bert_lstm_crf_forward(params, token_ids, attention_masks, token_type_ids, cfg):
    B, S = token_ids.shape
    H, nh = cfg["hidden"], cfg["heads"]

    # Embeddings: gather stays in JAX glue (no clean Pallas gather); LN kernel has no dummy residual.
    x = (jnp.take(params["word_emb"], token_ids, axis=0)
         + params["pos_emb"][:S][None, :, :]
         + jnp.take(params["type_emb"], token_type_ids, axis=0))
    x2d = layernorm(x.reshape(B * S, H), params["emb_ln_g"], params["emb_ln_b"])

    mask_add = ((1.0 - attention_masks.astype(F32)) * -10000.0)[:, None, :]   # (B, 1, S)

    for lp in params["layers"]:
        qkv = dense(x2d, lp["wqkv"], lp["bqkv"])                     # fused Q/K/V projection
        ctx = attention(qkv.reshape(B, S, 3 * H), mask_add, H, nh)   # heads split in-kernel
        x2d = dense_add_layernorm(ctx.reshape(B * S, H), lp["wo"], lp["bo"],
                                  x2d, lp["attn_ln_g"], lp["attn_ln_b"])
        h1 = dense(x2d, lp["w1"], lp["b1"], act="gelu")
        x2d = dense_add_layernorm(h1, lp["w2"], lp["b2"],
                                  x2d, lp["ffn_ln_g"], lp["ffn_ln_b"])

    # Single layout change to time-major; LSTM / classifier / CRF all stay time-major.
    seq_tm = x2d.reshape(B, S, H).transpose(1, 0, 2).reshape(S * B, H)

    # Bidirectional LSTM (batch_first in torch; h0 = c0 = 0). Input projections as tiled dense,
    # both directions' recurrences fused into one kernel; time reversal via index math.
    L = params["lstm"]
    gx_f = dense(seq_tm, L["w_ih_f"], L["b_f"]).reshape(S, B, 4 * H)
    gx_r = dense(seq_tm, L["w_ih_r"], L["b_r"]).reshape(S, B, 4 * H)
    lstm_out = bilstm(gx_f, gx_r, L["w_hh_f"], L["w_hh_r"], H)       # (S, B, 2H)

    emissions = dense(lstm_out.reshape(S * B, 2 * H), params["clf_w"], params["clf_b"])
    emissions = emissions.reshape(S, B, cfg["tag_pad"])              # lane-dense, pad tags = -1e9

    tags = crf_viterbi_decode(emissions, params["crf_transT"],
                              params["crf_start"], params["crf_end"])   # (B, S)
    # labels is None -> loss is None (CRF NLL not computed), same as the PyTorch forward.
    return tags, None


if __name__ == "__main__":
    cfg = dict(vocab=100, hidden=32, heads=2, layers=2, inter=128, max_pos=64,
               num_tags=5, tag_pad=128, seq=8, batch=2)
    key = jax.random.PRNGKey(0)
    pkey, ikey = jax.random.split(key)
    params = init_params(pkey, cfg)

    token_ids = jax.random.randint(ikey, (cfg["batch"], cfg["seq"]), 0, cfg["vocab"],
                                   dtype=jnp.int32)
    attention_masks = jnp.ones((cfg["batch"], cfg["seq"]), dtype=jnp.int32)
    token_type_ids = jnp.zeros((cfg["batch"], cfg["seq"]), dtype=jnp.int32)

    tags, loss = bert_lstm_crf_forward(params, token_ids, attention_masks, token_type_ids, cfg)
    tags = jax.block_until_ready(tags)

    # crf.decode returns a Python list of per-sequence tag lists.
    logits = np.asarray(tags).tolist()
    assert len(logits) == cfg["batch"] and len(logits[0]) == cfg["seq"]
    assert all(0 <= t < cfg["num_tags"] for row in logits for t in row)
    assert loss is None
    print("KERNEL_OK")
</pallas_src>

<mosaic_0001>
module attributes {stable_mosaic.version = 11 : i64} {
  func.func @_ln_kernel(%arg0: i32, %arg1: memref<16x32xf32, #tpu.memory_space<vmem>>, %arg2: memref<1x32xf32, #tpu.memory_space<vmem>>, %arg3: memref<1x32xf32, #tpu.memory_space<vmem>>, %arg4: memref<16x32xf32, #tpu.memory_space<vmem>>) attributes {dimension_semantics = [#tpu.dimension_semantics<parallel>], iteration_bounds = array<i64: 1>, scalar_prefetch = 0 : i64, scratch_operands = 0 : i64, tpu.core_type = #tpu.core_type<tc>, window_params = [{transform_indices = @transform_0, window_bounds = array<i64: 16, 32>}, {pipeline_mode = #tpu.pipeline_mode<synchronous>, transform_indices = @transform_1, window_bounds = array<i64: 1, 32>}, {pipeline_mode = #tpu.pipeline_mode<synchronous>, transform_indices = @transform_2, window_bounds = array<i64: 1, 32>}, {transform_indices = @transform_3, window_bounds = array<i64: 16, 32>}]} {
    %c0 = arith.constant 0 : index
    %c0_0 = arith.constant 0 : index
    %0 = vector.load %arg1[%c0, %c0_0] : memref<16x32xf32, #tpu.memory_space<vmem>>, vector<16x32xf32>
    %cst = arith.constant dense<0.000000e+00> : vector<16xf32>
    %1 = vector.multi_reduction <add>, %0, %cst [1] : vector<16x32xf32> to vector<16xf32>
    %2 = vector.shape_cast %1 : vector<16xf32> to vector<16x1xf32>
    %cst_1 = arith.constant 3.200000e+01 : f32
    %3 = vector.broadcast %cst_1 : f32 to vector<16x1xf32>
    %4 = arith.divf %2, %3 : vector<16x1xf32>
    %5 = vector.broadcast %4 : vector<16x1xf32> to vector<16x32xf32>
    %6 = arith.subf %0, %5 : vector<16x32xf32>
    %7 = arith.mulf %6, %6 : vector<16x32xf32>
    %cst_2 = arith.constant dense<0.000000e+00> : vector<16xf32>
    %8 = vector.multi_reduction <add>, %7, %cst_2 [1] : vector<16x32xf32> to vector<16xf32>
    %9 = vector.shape_cast %8 : vector<16xf32> to vector<16x1xf32>
    %cst_3 = arith.constant 3.200000e+01 : f32
    %10 = vector.broadcast %cst_3 : f32 to vector<16x1xf32>
    %11 = arith.divf %9, %10 : vector<16x1xf32>
    %cst_4 = arith.constant 9.99999996E-13 : f32
    %12 = vector.broadcast %cst_4 : f32 to vector<16x1xf32>
    %13 = arith.addf %11, %12 : vector<16x1xf32>
    %14 = math.rsqrt %13 : vector<16x1xf32>
    %15 = vector.broadcast %14 : vector<16x1xf32> to vector<16x32xf32>
    %16 = arith.mulf %6, %15 : vector<16x32xf32>
    %c0_5 = arith.constant 0 : index
    %c0_6 = arith.constant 0 : index
    %17 = vector.load %arg2[%c0_5, %c0_6] : memref<1x32xf32, #tpu.memory_space<vmem>>, vector<1x32xf32>
    %18 = vector.broadcast %17 : vector<1x32xf32> to vector<16x32xf32>
    %19 = arith.mulf %16, %18 : vector<16x32xf32>
    %c0_7 = arith.constant 0 : index
    %c0_8 = arith.constant 0 : index
    %20 = vector.load %arg3[%c0_7, %c0_8] : memref<1x32xf32, #tpu.memory_space<vmem>>, vector<1x32xf32>
    %21 = vector.broadcast %20 : vector<1x32xf32> to vector<16x32xf32>
    %22 = arith.addf %19, %21 : vector<16x32xf32>
    %c0_9 = arith.constant 0 : index
    %c0_10 = arith.constant 0 : index
    %23 = vector.load %arg4[%c0_9, %c0_10] : memref<16x32xf32, #tpu.memory_space<vmem>>, vector<16x32xf32>
    tpu.vector_store %arg4[%c0_9, %c0_10], %22 {strides = array<i32>} : memref<16x32xf32, #tpu.memory_space<vmem>>, vector<16x32xf32>,
    return
  }
  func.func @transform_0(%arg0: i32) -> (i32, i32) {
    %c0_i32 = arith.constant 0 : i32
    %c0_i32_0 = arith.constant 0 : i32
    return %arg0, %c0_i32 : i32, i32
  }
  func.func @transform_1(%arg0: i32) -> (i32, i32) {
    %c0_i32 = arith.constant 0 : i32
    %c0_i32_0 = arith.constant 0 : i32
    %c0_i32_1 = arith.constant 0 : i32
    return %c0_i32, %c0_i32_0 : i32, i32
  }
  func.func @transform_2(%arg0: i32) -> (i32, i32) {
    %c0_i32 = arith.constant 0 : i32
    %c0_i32_0 = arith.constant 0 : i32
    %c0_i32_1 = arith.constant 0 : i32
    return %c0_i32, %c0_i32_0 : i32, i32
  }
  func.func @transform_3(%arg0: i32) -> (i32, i32) {
    %c0_i32 = arith.constant 0 : i32
    %c0_i32_0 = arith.constant 0 : i32
    return %arg0, %c0_i32 : i32, i32
  }
}

</mosaic_0001>

<bundles_post_ra>
// kernel: tpu_custom_call.1
= control target key start
LH: loop header
LB: loop body
LE: loop exit
PB: predicated region body
PF: predicated region fallthrough
CT: control target
= control target key end

     0   :  { %8 = vsyncpa [#allocation3], 0  ;;  %s220_s0 = inlined_call_operand.hbm [shape: f32[16,32], index: 0, kind: input, shape index: {}]   ;;  %s221_s1 = inlined_call_operand.vmem [shape: f32[1,32], index: 1, kind: input, shape index: {}]   ;;  %s222_s2 = inlined_call_operand.vmem [shape: f32[1,32], index: 2, kind: input, shape index: {}]   ;;  %s223_s3 = inlined_call_operand.hbm [shape: f32[16,32], index: 3, kind: output, shape index: {}]  }
   0x1   :  { %9 = vsyncpa [#allocation4], 0  ;;  %s154_s12 = smov [#allocation2]   ;;  %s106_s16 = scalar_lea.hbm %s220_s0, 256 }
   0x2   :  { %s15_s13 = sshll.u32 %s154_s12, 4  ;;  %p107_p0 = scmp.ne.s32.totalorder %s220_s0, %s106_s16  ;;  %s16_s13 = int_to_ptr.vmem [resolvable:$true] %s15_s13 }
   0x3   :  { %p110_p1 = scmp.lt.u32.totalorder %s106_s16, %s220_s0 }
   0x5   :  { %p112_p2 = pnand %p110_p1, %p107_p0 }
   0x7   :  { %115 = shalt.err (!%p112_p2)
}
   0x8   :  { %s116_s21 = scalar_lea.vmem %s16_s13, 256  ;;  %p121_p4 = scmp.lt.s32.totalorder %s16_s13, %s16_s13 }
   0x9   :  { %p117_p3 = scmp.ne.s32.totalorder %s16_s13, %s116_s21  ;;  %p122_p5 = scmp.lt.s32.totalorder %s116_s21, %s116_s21 }
   0xb   :  { %p123_p6 = por %p122_p5, %p121_p4 }
   0xd   :  { %p124_p7 = pnand %p123_p6, %p117_p3 }
   0xf   :  { %127 = shalt.err (!%p124_p7)
}
  0x10   :  { %s155_s22 = smov 128   ;;  %s156_s23 = smov 8  }
  0x11   :  { %21 = dma.hbm_to_vmem [thread:$0]  %s220_s0, 256, %s16_s13, [#allocation3], %s155_s22, %s155_s22, %s156_s23  }
  0x12   :  { %150 = dma.done.wait [#allocation3], 256  }
  0x13   :  { %151 = vsyncadd [#allocation3], 4294967040  ;;  %vm31_vm0 = vcmask 261120   ;;  %v29_v0 = vld [vmem:[#allocation2] sm:$0xff]  ;;  %v30_v1 = vld [vmem:[#allocation2 + $0x8] sm:$0xff]  ;;  %s157_s29 = smov [#allocation5]  }
  0x14   :  { %v32_v2 = vsel %vm31_vm0, %v29_v0, 0.0  ;;  %v35_v3 = vsel %vm31_vm0, %v30_v1, 0.0  ;;  %v96_v21 = vld [vmem:[%s221_s1] ss:$0 sm:$0xff]  ;;  %s84_s30 = sshll.u32 %s157_s29, 4  ;;  %s85_s30 = int_to_ptr.vmem [resolvable:$true] %s84_s30 }
  0x15   :  { %33 = vadd.xlane.f32.xlu0 %v32_v2  ;;  %v97_v23 = vld [vmem:[%s222_s2] ss:$0 sm:$0xff]  ;;  %s128_s4 = scalar_lea.vmem %s85_s30, 256  ;;  %p133_p9 = scmp.lt.s32.totalorder %s85_s30, %s85_s30 }
  0x16   :  { %p129_p8 = scmp.ne.s32.totalorder %s85_s30, %s128_s4  ;;  %p134_p10 = scmp.lt.s32.totalorder %s128_s4, %s128_s4 }
  0x18   :  { %p135_p11 = por %p134_p10, %p133_p9 }
  0x19   :  { %36 = vadd.xlane.f32.xlu0 %v35_v3 }
  0x1a   :  { %p136_p12 = pnand %p135_p11, %p129_p8 }
  0xa2   :  { %v34_v4 = vpop.xlane.xlu0 %33 }
  0xa3   :  { %v39_v5 = vmul.f32 0.03125, %v34_v4 }
  0xa5   :  { %v41_v6 = vsub.f32 %v29_v0, %v39_v5 }
  0xa6   :  { %v37_v7 = vpop.xlane.xlu0 %36 }
  0xa7   :  { %v40_v8 = vmul.f32 0.03125, %v37_v7  ;;  %v43_v9 = vmul.f32 %v41_v6, %v41_v6 }
  0xa9   :  { %v42_v10 = vsub.f32 %v30_v1, %v40_v8  ;;  %v45_v11 = vsel %vm31_vm0, %v43_v9, 0.0 }
  0xaa   :  { %46 = vadd.xlane.f32.xlu1 %v45_v11 }
  0xab   :  { %v44_v12 = vmul.f32 %v42_v10, %v42_v10 }
  0xad   :  { %v48_v13 = vsel %vm31_vm0, %v44_v12, 0.0 }
  0xae   :  { %49 = vadd.xlane.f32.xlu1 %v48_v13 }
 0x137   :  { %v47_v14 = vpop.xlane.xlu1 %46 }
 0x138   :  { %v51_v15 = vmul.f32 0.03125, %v47_v14 }
 0x13a   :  { %v53_v16 = vadd.f32 1e-12, %v51_v15 }
 0x13b   :  { %v50_v17 = vpop.xlane.xlu1 %49 }
 0x13c   :  { %102 = vrsqrt.f32 %v53_v16  ;;  %v52_v18 = vmul.f32 0.03125, %v50_v17 }
 0x13e   :  { %v54_v19 = vadd.f32 1e-12, %v52_v18 }
 0x140   :  { %104 = vrsqrt.f32 %v54_v19 }
 0x146   :  { %v103_v20 = vpop.eup %102 }
 0x147   :  { %v57_v22 = vmul.f32 %v103_v20, %v41_v6 }
 0x149   :  { %v66_v24 = vmul.f32 %v96_v21, %v57_v22 }
 0x14a   :  { %v105_v25 = vpop.eup %104 }
 0x14b   :  { %v58_v26 = vmul.f32 %v105_v25, %v42_v10  ;;  %v75_v27 = vadd.f32 %v97_v23, %v66_v24 }
 0x14d   :  { %v67_v28 = vmul.f32 %v96_v21, %v58_v26  ;;  %77 = vst.msk [vmem:[#allocation5] sm:$0xff] %vm31_vm0, %v75_v27 }
 0x14f   :  { %v76_v29 = vadd.f32 %v97_v23, %v67_v28 }
 0x151   :  { %78 = vst.msk [vmem:[#allocation5 + $0x8] sm:$0xff] %vm31_vm0, %v76_v29 }
 0x152   :  { %139 = shalt.err (!%p136_p12)
}
 0x153   :  { %s140_s5 = scalar_lea.hbm %s223_s3, 256 }
 0x154   :  { %p141_p13 = scmp.ne.s32.totalorder %s223_s3, %s140_s5  ;;  %p144_p0 = scmp.lt.u32.totalorder %s140_s5, %s223_s3 }
 0x156   :  { %p146_p1 = pnand %p144_p0, %p141_p13 }
 0x158   :  { %149 = shalt.err (!%p146_p1)
}
 0x159   :  { %90 = dma.vmem_to_hbm [thread:$0]  %s85_s30, 256, %s223_s3, [#allocation4], %s155_s22, %s155_s22, %s156_s23  }
 0x15a   :  { %152 = dma.done.wait [#allocation4], 256  }
 0x15b   :  { %153 = vsyncadd [#allocation4], 4294967040 }
 0x15c   :  { %94 = vsyncpa [#allocation3], 1 }
 0x15d   :  { %95 = vsyncpa [#allocation4], 1 }

</bundles_post_ra>
